<compile_context>
chip_gen: v6e
topology: v6e:2x2x1
jax: 0.10.0
libtpu: 0.0.40
codegen_flags: <defaults>
</compile_context>

<pallas_src>
import functools

import jax
import jax.numpy as jnp
from jax.experimental import pallas as pl
from jax.experimental.pallas import tpu as pltpu

_VMEM_LIMIT = 32 * 1024 * 1024   # raise + re-sweep tile sizes at non-toy shapes


# -----------------------------------------------------------------------------
# Kernel 1: 3x3 "same" conv as ONE MXU matmul of depth 9*Cin_p per batch image.
#   x_ref : (1, Cin_p, L)     zero-padded flat image (channel-major);
#                             L = Hp*Wp + 2*(Wp+1) so every tap is a contiguous
#                             lane-slice of length Hp*Wp.
#   w_ref : (Cout, 9*Cin_p)   bf16 taps-major flattened weights (VMEM-resident)
#   b_ref : (Cout, 1)         f32 bias column                (VMEM-resident)
#   o_ref : (1, Cout, Hp*Wp)  f32 conv output at all padded positions; invalid
#                             border columns are dropped by the wrapper before
#                             any statistics are taken.
# -----------------------------------------------------------------------------
def _conv3x3_kernel(x_ref, w_ref, b_ref, o_ref, *, tap_starts, hw_pad):
    # 9 shifted views, each a static lane-offset load from VMEM (no im2col in HBM).
    taps = [x_ref[0, :, pl.ds(s, hw_pad)] for s in tap_starts]      # 9 x (Cin_p, HpWp)
    xt = jnp.concatenate(taps, axis=0).astype(jnp.bfloat16)         # (9*Cin_p, HpWp)
    acc = jnp.dot(w_ref[...], xt, preferred_element_type=jnp.float32)  # (Cout, HpWp)
    o_ref[0] = acc + b_ref[...]


def hconv3x3(x_nchw, w, b):
    """x_nchw: (N, Cin, H, W); w: (9, Cin, Cout); b: (Cout, 1) -> (Cout, N*H*W)."""
    N, Cin, H, W = x_nchw.shape
    Cout = w.shape[-1]
    Hp, Wp = H + 2, W + 2
    hw_pad = Hp * Wp
    P = Wp + 1                       # extra flat padding so all 9 taps are slices
    L = hw_pad + 2 * P

    # Pad channels to a sublane multiple so the tap concat is tile-aligned.
    Cin_p = ((Cin + 7) // 8) * 8
    if Cin_p != Cin:
        x_nchw = jnp.pad(x_nchw, ((0, 0), (0, Cin_p - Cin), (0, 0), (0, 0)))
        w = jnp.pad(w, ((0, 0), (0, Cin_p - Cin), (0, 0)))

    # Single copy of the input in HBM: spatial zero-pad, flatten, flat-pad.
    xp = jnp.pad(x_nchw, ((0, 0), (0, 0), (1, 1), (1, 1)))          # (N, Cin_p, Hp, Wp)
    xf = jnp.pad(xp.reshape(N, Cin_p, hw_pad), ((0, 0), (0, 0), (P, P)))  # (N, Cin_p, L)

    # Taps-major flattened weight: w_flat[o, k*Cin_p + c] = w[k, c, o]  (bf16 MXU).
    w_flat = jnp.transpose(w, (2, 0, 1)).reshape(Cout, 9 * Cin_p).astype(jnp.bfloat16)

    # Tap (dy, dx) reads flat offset (dy-1)*Wp + (dx-1) relative to the output pos.
    tap_starts = tuple(P + (dy - 1) * Wp + (dx - 1)
                       for dy in range(3) for dx in range(3))

    out = pl.pallas_call(
        functools.partial(_conv3x3_kernel, tap_starts=tap_starts, hw_pad=hw_pad),
        out_shape=jax.ShapeDtypeStruct((N, Cout, hw_pad), jnp.float32),
        grid=(N,),
        in_specs=[
            pl.BlockSpec((1, Cin_p, L), lambda n: (n, 0, 0)),
            pl.BlockSpec((Cout, 9 * Cin_p), lambda n: (0, 0)),   # weights stay resident
            pl.BlockSpec((Cout, 1), lambda n: (0, 0)),           # bias stays resident
        ],
        out_specs=pl.BlockSpec((1, Cout, hw_pad), lambda n: (n, 0, 0)),
        compiler_params=pltpu.CompilerParams(
            dimension_semantics=("parallel",),
            vmem_limit_bytes=_VMEM_LIMIT),
    )(xf, w_flat, b)

    # Drop padded border positions, flatten to a lane-dense (Cout, N*H*W) slab.
    y = out.reshape(N, Cout, Hp, Wp)[:, :, 1:H + 1, 1:W + 1]
    return jnp.transpose(y, (1, 0, 2, 3)).reshape(Cout, N * H * W)


# -----------------------------------------------------------------------------
# Kernel 2: fused BatchNorm-apply (scale/shift pre-folded from global batch
#           stats) + ScalarGate2d gate, tiled over M (lane axis), "parallel".
#   y_ref: (C, TM) channel-major tile; out = ybn * sigmoid(W2 @ relu(W1 @ ybn + b1) + b2)
# -----------------------------------------------------------------------------
def _bn_gate_kernel(y_ref, scale_ref, shift_ref, w1_ref, b1_ref, w2_ref, b2_ref,
                    o_ref):
    ybn = y_ref[...] * scale_ref[...] + shift_ref[...]               # (C, TM) f32
    yb16 = ybn.astype(jnp.bfloat16)
    h = jnp.dot(w1_ref[...], yb16, preferred_element_type=jnp.float32) + b1_ref[...]
    h = jnp.maximum(h, 0.0)
    g = jnp.dot(w2_ref[...], h.astype(jnp.bfloat16),
                preferred_element_type=jnp.float32) + b2_ref[...]
    g = jax.nn.sigmoid(g)
    o_ref[...] = ybn * g


def _pick_m_tile(m):
    # Largest lane-aligned tile that still gives >= 2 grid steps (2 TCs on v7x).
    for tm in (2048, 1024, 512, 256, 128):
        if m % tm == 0 and m // tm >= 2:
            return tm
    return m


def bn_gate(y, gamma, beta, w1, b1, w2, b2, eps=1e-5):
    """y: (C, M) channel-major -> (C, M). Training-mode batch stats + scalar gate."""
    C, M = y.shape

    # Tiny global statistics pass (must be global — per-tile stats would be wrong).
    mean = jnp.mean(y, axis=1, keepdims=True)
    var = jnp.mean(jnp.square(y - mean), axis=1, keepdims=True)      # biased, as in BN training
    inv = jax.lax.rsqrt(var + eps)
    scale = gamma * inv                                              # (C, 1)
    shift = beta - mean * scale                                      # (C, 1)

    # In (C, M) layout the row-layout gate y @ W + b becomes W^T @ y + b.
    w1t = jnp.transpose(w1).astype(jnp.bfloat16)
    w2t = jnp.transpose(w2).astype(jnp.bfloat16)

    tm = _pick_m_tile(M)
    const = lambda i: (0, 0)
    return pl.pallas_call(
        _bn_gate_kernel,
        out_shape=jax.ShapeDtypeStruct((C, M), jnp.float32),
        grid=(M // tm,),
        in_specs=[
            pl.BlockSpec((C, tm), lambda i: (0, i)),
            pl.BlockSpec((C, 1), const),
            pl.BlockSpec((C, 1), const),
            pl.BlockSpec((C, C), const),
            pl.BlockSpec((C, 1), const),
            pl.BlockSpec((C, C), const),
            pl.BlockSpec((C, 1), const),
        ],
        out_specs=pl.BlockSpec((C, tm), lambda i: (0, i)),
        compiler_params=pltpu.CompilerParams(
            dimension_semantics=("parallel",),
            vmem_limit_bytes=_VMEM_LIMIT),
    )(y, scale, shift, w1t, b1, w2t, b2)


# -----------------------------------------------------------------------------
# Parameter construction (deterministic, in-script).
# -----------------------------------------------------------------------------
def init_params(key, in_repr, out_repr, size=3):
    cin = sum(in_repr)
    cout = sum(out_repr)
    kk = size * size
    ks = jax.random.split(key, 6)

    def conv_w(k, ci, co):
        return jax.random.normal(k, (kk, ci, co), jnp.float32) / jnp.sqrt(float(kk * ci))

    def gate_w(k, c):
        return jax.random.normal(k, (c, c), jnp.float32) / jnp.sqrt(float(c))

    return {
        "conv1_w": conv_w(ks[0], cin, cout), "conv1_b": jnp.zeros((cout, 1), jnp.float32),
        "conv2_w": conv_w(ks[1], cout, cout), "conv2_b": jnp.zeros((cout, 1), jnp.float32),
        "bn1_gamma": jnp.ones((cout, 1), jnp.float32), "bn1_beta": jnp.zeros((cout, 1), jnp.float32),
        "bn2_gamma": jnp.ones((cout, 1), jnp.float32), "bn2_beta": jnp.zeros((cout, 1), jnp.float32),
        "gate1_w1": gate_w(ks[2], cout), "gate1_b1": jnp.zeros((cout, 1), jnp.float32),
        "gate1_w2": gate_w(ks[3], cout), "gate1_b2": jnp.zeros((cout, 1), jnp.float32),
        "gate2_w1": gate_w(ks[4], cout), "gate2_b1": jnp.zeros((cout, 1), jnp.float32),
        "gate2_w2": gate_w(ks[5], cout), "gate2_b2": jnp.zeros((cout, 1), jnp.float32),
    }


def _to_nchw(y_cm, n, h, w):
    c = y_cm.shape[0]
    return jnp.transpose(y_cm.reshape(c, n, h, w), (1, 0, 2, 3))


# -----------------------------------------------------------------------------
# Forward pass of the block.
# -----------------------------------------------------------------------------
@jax.jit
def hnet_conv_block(x_nchw, params):
    N, _, H, W = x_nchw.shape

    # conv1 -> bnorm1 -> nonl1
    y = hconv3x3(x_nchw, params["conv1_w"], params["conv1_b"])       # (Cout, N*H*W)
    y = bn_gate(y, params["bn1_gamma"], params["bn1_beta"],
                params["gate1_w1"], params["gate1_b1"],
                params["gate1_w2"], params["gate1_b2"])

    # conv2 -> bnorm2 -> nonl2
    y = hconv3x3(_to_nchw(y, N, H, W), params["conv2_w"], params["conv2_b"])
    y = bn_gate(y, params["bn2_gamma"], params["bn2_beta"],
                params["gate2_w1"], params["gate2_b1"],
                params["gate2_w2"], params["gate2_b2"])

    # dropout: eval-mode identity
    return _to_nchw(y, N, H, W)                                      # NCHW


if __name__ == "__main__":
    key = jax.random.PRNGKey(0)
    k_x, k_p = jax.random.split(key)

    in_repr = (2, 2)    # sum = 4 input channels
    out_repr = (4, 4)   # sum = 8 output channels
    N, H, W = 2, 16, 16

    x = jax.random.normal(k_x, (N, sum(in_repr), H, W), jnp.float32)
    params = init_params(k_p, in_repr, out_repr, size=3)

    out = jax.block_until_ready(hnet_conv_block(x, params))

    assert out.shape == (N, sum(out_repr), H, W), out.shape
    assert bool(jnp.all(jnp.isfinite(out)))
    print("KERNEL_OK")
</pallas_src>

<mosaic_0001>
module attributes {stable_mosaic.version = 11 : i64} {
  func.func @_conv3x3_kernel(%arg0: i32, %arg1: memref<1x8x362xf32, #tpu.memory_space<vmem>>, %arg2: memref<8x72xbf16, #tpu.memory_space<vmem>>, %arg3: memref<8x1xf32, #tpu.memory_space<vmem>>, %arg4: memref<1x8x324xf32, #tpu.memory_space<vmem>>) attributes {dimension_semantics = [#tpu.dimension_semantics<parallel>], iteration_bounds = array<i64: 2>, scalar_prefetch = 0 : i64, scratch_operands = 0 : i64, tpu.core_type = #tpu.core_type<tc>, window_params = [{transform_indices = @transform_0, window_bounds = array<i64: 1, 8, 362>}, {pipeline_mode = #tpu.pipeline_mode<synchronous>, transform_indices = @transform_1, window_bounds = array<i64: 8, 72>}, {pipeline_mode = #tpu.pipeline_mode<synchronous>, transform_indices = @transform_2, window_bounds = array<i64: 8, 1>}, {transform_indices = @transform_3, window_bounds = array<i64: 1, 8, 324>}]} {
    %c0 = arith.constant 0 : index
    %c0_0 = arith.constant 0 : index
    %c0_1 = arith.constant 0 : index
    %0 = vector.load %arg1[%c0, %c0_0, %c0_1] : memref<1x8x362xf32, #tpu.memory_space<vmem>>, vector<1x8x324xf32>
    %1 = vector.shape_cast %0 : vector<1x8x324xf32> to vector<8x324xf32>
    %c0_2 = arith.constant 0 : index
    %c0_3 = arith.constant 0 : index
    %c1 = arith.constant 1 : index
    %2 = vector.load %arg1[%c0_2, %c0_3, %c1] : memref<1x8x362xf32, #tpu.memory_space<vmem>>, vector<1x8x324xf32>
    %3 = vector.shape_cast %2 : vector<1x8x324xf32> to vector<8x324xf32>
    %c0_4 = arith.constant 0 : index
    %c0_5 = arith.constant 0 : index
    %c2 = arith.constant 2 : index
    %4 = vector.load %arg1[%c0_4, %c0_5, %c2] : memref<1x8x362xf32, #tpu.memory_space<vmem>>, vector<1x8x324xf32>
    %5 = vector.shape_cast %4 : vector<1x8x324xf32> to vector<8x324xf32>
    %c0_6 = arith.constant 0 : index
    %c0_7 = arith.constant 0 : index
    %c18 = arith.constant 18 : index
    %6 = vector.load %arg1[%c0_6, %c0_7, %c18] : memref<1x8x362xf32, #tpu.memory_space<vmem>>, vector<1x8x324xf32>
    %7 = vector.shape_cast %6 : vector<1x8x324xf32> to vector<8x324xf32>
    %c0_8 = arith.constant 0 : index
    %c0_9 = arith.constant 0 : index
    %c19 = arith.constant 19 : index
    %8 = vector.load %arg1[%c0_8, %c0_9, %c19] : memref<1x8x362xf32, #tpu.memory_space<vmem>>, vector<1x8x324xf32>
    %9 = vector.shape_cast %8 : vector<1x8x324xf32> to vector<8x324xf32>
    %c0_10 = arith.constant 0 : index
    %c0_11 = arith.constant 0 : index
    %c20 = arith.constant 20 : index
    %10 = vector.load %arg1[%c0_10, %c0_11, %c20] : memref<1x8x362xf32, #tpu.memory_space<vmem>>, vector<1x8x324xf32>
    %11 = vector.shape_cast %10 : vector<1x8x324xf32> to vector<8x324xf32>
    %c0_12 = arith.constant 0 : index
    %c0_13 = arith.constant 0 : index
    %c36 = arith.constant 36 : index
    %12 = vector.load %arg1[%c0_12, %c0_13, %c36] : memref<1x8x362xf32, #tpu.memory_space<vmem>>, vector<1x8x324xf32>
    %13 = vector.shape_cast %12 : vector<1x8x324xf32> to vector<8x324xf32>
    %c0_14 = arith.constant 0 : index
    %c0_15 = arith.constant 0 : index
    %c37 = arith.constant 37 : index
    %14 = vector.load %arg1[%c0_14, %c0_15, %c37] : memref<1x8x362xf32, #tpu.memory_space<vmem>>, vector<1x8x324xf32>
    %15 = vector.shape_cast %14 : vector<1x8x324xf32> to vector<8x324xf32>
    %c0_16 = arith.constant 0 : index
    %c0_17 = arith.constant 0 : index
    %c38 = arith.constant 38 : index
    %16 = vector.load %arg1[%c0_16, %c0_17, %c38] : memref<1x8x362xf32, #tpu.memory_space<vmem>>, vector<1x8x324xf32>
    %17 = vector.shape_cast %16 : vector<1x8x324xf32> to vector<8x324xf32>
    %18 = tpu.concatenate %1, %3, %5, %7, %9, %11, %13, %15, %17 in 0 : vector<8x324xf32>, vector<8x324xf32>, vector<8x324xf32>, vector<8x324xf32>, vector<8x324xf32>, vector<8x324xf32>, vector<8x324xf32>, vector<8x324xf32>, vector<8x324xf32> -> vector<72x324xf32>
    %19 = arith.truncf %18 : vector<72x324xf32> to vector<72x324xbf16>
    %c0_18 = arith.constant 0 : index
    %c0_19 = arith.constant 0 : index
    %20 = vector.load %arg2[%c0_18, %c0_19] : memref<8x72xbf16, #tpu.memory_space<vmem>>, vector<8x72xbf16>
    %cst = arith.constant dense<0.000000e+00> : vector<8x324xf32>
    %21 = tpu.matmul %20, %19, %cst {dimension_numbers = #tpu.dot_dimension_numbers<[1], [0], [0], [1], [0, 0, 1, 1], [], []>} : vector<8x72xbf16>, vector<72x324xbf16>, vector<8x324xf32> -> vector<8x324xf32>
    %c0_20 = arith.constant 0 : index
    %c0_21 = arith.constant 0 : index
    %22 = vector.load %arg3[%c0_20, %c0_21] : memref<8x1xf32, #tpu.memory_space<vmem>>, vector<8x1xf32>
    %23 = vector.broadcast %22 : vector<8x1xf32> to vector<8x324xf32>
    %24 = arith.addf %21, %23 : vector<8x324xf32>
    %c0_22 = arith.constant 0 : index
    %c0_23 = arith.constant 0 : index
    %c0_24 = arith.constant 0 : index
    %25 = vector.load %arg4[%c0_22, %c0_23, %c0_24] : memref<1x8x324xf32, #tpu.memory_space<vmem>>, vector<1x8x324xf32>
    %26 = vector.shape_cast %25 : vector<1x8x324xf32> to vector<8x324xf32>
    %27 = vector.shape_cast %24 : vector<8x324xf32> to vector<1x8x324xf32>
    tpu.vector_store %arg4[%c0_22, %c0_23, %c0_24], %27 {strides = array<i32>} : memref<1x8x324xf32, #tpu.memory_space<vmem>>, vector<1x8x324xf32>,
    return
  }
  func.func @transform_0(%arg0: i32) -> (i32, i32, i32) {
    %c0_i32 = arith.constant 0 : i32
    %c0_i32_0 = arith.constant 0 : i32
    %c0_i32_1 = arith.constant 0 : i32
    return %arg0, %c0_i32, %c0_i32_0 : i32, i32, i32
  }
  func.func @transform_1(%arg0: i32) -> (i32, i32) {
    %c0_i32 = arith.constant 0 : i32
    %c0_i32_0 = arith.constant 0 : i32
    %c0_i32_1 = arith.constant 0 : i32
    return %c0_i32, %c0_i32_0 : i32, i32
  }
  func.func @transform_2(%arg0: i32) -> (i32, i32) {
    %c0_i32 = arith.constant 0 : i32
    %c0_i32_0 = arith.constant 0 : i32
    %c0_i32_1 = arith.constant 0 : i32
    return %c0_i32, %c0_i32_0 : i32, i32
  }
  func.func @transform_3(%arg0: i32) -> (i32, i32, i32) {
    %c0_i32 = arith.constant 0 : i32
    %c0_i32_0 = arith.constant 0 : i32
    %c0_i32_1 = arith.constant 0 : i32
    return %arg0, %c0_i32, %c0_i32_0 : i32, i32, i32
  }
}

module attributes {stable_mosaic.version = 11 : i64} {
  func.func @_bn_gate_kernel(%arg0: i32, %arg1: memref<8x256xf32, #tpu.memory_space<vmem>>, %arg2: memref<8x1xf32, #tpu.memory_space<vmem>>, %arg3: memref<8x1xf32, #tpu.memory_space<vmem>>, %arg4: memref<8x8xbf16, #tpu.memory_space<vmem>>, %arg5: memref<8x1xf32, #tpu.memory_space<vmem>>, %arg6: memref<8x8xbf16, #tpu.memory_space<vmem>>, %arg7: memref<8x1xf32, #tpu.memory_space<vmem>>, %arg8: memref<8x256xf32, #tpu.memory_space<vmem>>) attributes {dimension_semantics = [#tpu.dimension_semantics<parallel>], iteration_bounds = array<i64: 2>, scalar_prefetch = 0 : i64, scratch_operands = 0 : i64, tpu.core_type = #tpu.core_type<tc>, window_params = [{transform_indices = @transform_0, window_bounds = array<i64: 8, 256>}, {pipeline_mode = #tpu.pipeline_mode<synchronous>, transform_indices = @transform_1, window_bounds = array<i64: 8, 1>}, {pipeline_mode = #tpu.pipeline_mode<synchronous>, transform_indices = @transform_2, window_bounds = array<i64: 8, 1>}, {pipeline_mode = #tpu.pipeline_mode<synchronous>, transform_indices = @transform_3, window_bounds = array<i64: 8, 8>}, {pipeline_mode = #tpu.pipeline_mode<synchronous>, transform_indices = @transform_4, window_bounds = array<i64: 8, 1>}, {pipeline_mode = #tpu.pipeline_mode<synchronous>, transform_indices = @transform_5, window_bounds = array<i64: 8, 8>}, {pipeline_mode = #tpu.pipeline_mode<synchronous>, transform_indices = @transform_6, window_bounds = array<i64: 8, 1>}, {transform_indices = @transform_7, window_bounds = array<i64: 8, 256>}]} {
    %c0 = arith.constant 0 : index
    %c0_0 = arith.constant 0 : index
    %0 = vector.load %arg1[%c0, %c0_0] : memref<8x256xf32, #tpu.memory_space<vmem>>, vector<8x256xf32>
    %c0_1 = arith.constant 0 : index
    %c0_2 = arith.constant 0 : index
    %1 = vector.load %arg2[%c0_1, %c0_2] : memref<8x1xf32, #tpu.memory_space<vmem>>, vector<8x1xf32>
    %2 = vector.broadcast %1 : vector<8x1xf32> to vector<8x256xf32>
    %3 = arith.mulf %0, %2 : vector<8x256xf32>
    %c0_3 = arith.constant 0 : index
    %c0_4 = arith.constant 0 : index
    %4 = vector.load %arg3[%c0_3, %c0_4] : memref<8x1xf32, #tpu.memory_space<vmem>>, vector<8x1xf32>
    %5 = vector.broadcast %4 : vector<8x1xf32> to vector<8x256xf32>
    %6 = arith.addf %3, %5 : vector<8x256xf32>
    %7 = arith.truncf %6 : vector<8x256xf32> to vector<8x256xbf16>
    %c0_5 = arith.constant 0 : index
    %c0_6 = arith.constant 0 : index
    %8 = vector.load %arg4[%c0_5, %c0_6] : memref<8x8xbf16, #tpu.memory_space<vmem>>, vector<8x8xbf16>
    %cst = arith.constant dense<0.000000e+00> : vector<8x256xf32>
    %9 = tpu.matmul %8, %7, %cst {dimension_numbers = #tpu.dot_dimension_numbers<[1], [0], [0], [1], [0, 0, 1, 1], [], []>} : vector<8x8xbf16>, vector<8x256xbf16>, vector<8x256xf32> -> vector<8x256xf32>
    %c0_7 = arith.constant 0 : index
    %c0_8 = arith.constant 0 : index
    %10 = vector.load %arg5[%c0_7, %c0_8] : memref<8x1xf32, #tpu.memory_space<vmem>>, vector<8x1xf32>
    %11 = vector.broadcast %10 : vector<8x1xf32> to vector<8x256xf32>
    %12 = arith.addf %9, %11 : vector<8x256xf32>
    %cst_9 = arith.constant 0.000000e+00 : f32
    %13 = vector.broadcast %cst_9 : f32 to vector<8x256xf32>
    %14 = arith.maximumf %12, %13 : vector<8x256xf32>
    %c0_10 = arith.constant 0 : index
    %c0_11 = arith.constant 0 : index
    %15 = vector.load %arg6[%c0_10, %c0_11] : memref<8x8xbf16, #tpu.memory_space<vmem>>, vector<8x8xbf16>
    %16 = arith.truncf %14 : vector<8x256xf32> to vector<8x256xbf16>
    %cst_12 = arith.constant dense<0.000000e+00> : vector<8x256xf32>
    %17 = tpu.matmul %15, %16, %cst_12 {dimension_numbers = #tpu.dot_dimension_numbers<[1], [0], [0], [1], [0, 0, 1, 1], [], []>} : vector<8x8xbf16>, vector<8x256xbf16>, vector<8x256xf32> -> vector<8x256xf32>
    %c0_13 = arith.constant 0 : index
    %c0_14 = arith.constant 0 : index
    %18 = vector.load %arg7[%c0_13, %c0_14] : memref<8x1xf32, #tpu.memory_space<vmem>>, vector<8x1xf32>
    %19 = vector.broadcast %18 : vector<8x1xf32> to vector<8x256xf32>
    %20 = arith.addf %17, %19 : vector<8x256xf32>
    %21 = arith.negf %20 : vector<8x256xf32>
    %22 = math.exp %21 : vector<8x256xf32>
    %cst_15 = arith.constant 1.000000e+00 : f32
    %23 = vector.broadcast %cst_15 : f32 to vector<8x256xf32>
    %24 = arith.addf %23, %22 : vector<8x256xf32>
    %25 = arith.divf %23, %24 : vector<8x256xf32>
    %26 = arith.mulf %6, %25 : vector<8x256xf32>
    %c0_16 = arith.constant 0 : index
    %c0_17 = arith.constant 0 : index
    %27 = vector.load %arg8[%c0_16, %c0_17] : memref<8x256xf32, #tpu.memory_space<vmem>>, vector<8x256xf32>
    tpu.vector_store %arg8[%c0_16, %c0_17], %26 {strides = array<i32>} : memref<8x256xf32, #tpu.memory_space<vmem>>, vector<8x256xf32>,
    return
  }
  func.func @transform_0(%arg0: i32) -> (i32, i32) {
    %c0_i32 = arith.constant 0 : i32
    %c0_i32_0 = arith.constant 0 : i32
    return %c0_i32, %arg0 : i32, i32
  }
  func.func @transform_1(%arg0: i32) -> (i32, i32) {
    %c0_i32 = arith.constant 0 : i32
    %c0_i32_0 = arith.constant 0 : i32
    %c0_i32_1 = arith.constant 0 : i32
    return %c0_i32, %c0_i32_0 : i32, i32
  }
  func.func @transform_2(%arg0: i32) -> (i32, i32) {
    %c0_i32 = arith.constant 0 : i32
    %c0_i32_0 = arith.constant 0 : i32
    %c0_i32_1 = arith.constant 0 : i32
    return %c0_i32, %c0_i32_0 : i32, i32
  }
  func.func @transform_3(%arg0: i32) -> (i32, i32) {
    %c0_i32 = arith.constant 0 : i32
    %c0_i32_0 = arith.constant 0 : i32
    %c0_i32_1 = arith.constant 0 : i32
    return %c0_i32, %c0_i32_0 : i32, i32
  }
  func.func @transform_4(%arg0: i32) -> (i32, i32) {
    %c0_i32 = arith.constant 0 : i32
    %c0_i32_0 = arith.constant 0 : i32
    %c0_i32_1 = arith.constant 0 : i32
    return %c0_i32, %c0_i32_0 : i32, i32
  }
  func.func @transform_5(%arg0: i32) -> (i32, i32) {
    %c0_i32 = arith.constant 0 : i32
    %c0_i32_0 = arith.constant 0 : i32
    %c0_i32_1 = arith.constant 0 : i32
    return %c0_i32, %c0_i32_0 : i32, i32
  }
  func.func @transform_6(%arg0: i32) -> (i32, i32) {
    %c0_i32 = arith.constant 0 : i32
    %c0_i32_0 = arith.constant 0 : i32
    %c0_i32_1 = arith.constant 0 : i32
    return %c0_i32, %c0_i32_0 : i32, i32
  }
  func.func @transform_7(%arg0: i32) -> (i32, i32) {
    %c0_i32 = arith.constant 0 : i32
    %c0_i32_0 = arith.constant 0 : i32
    return %c0_i32, %arg0 : i32, i32
  }
}

</mosaic_0001>

<bundles_post_ra>
// kernel: hnet_conv_block.4
= control target key start
LH: loop header
LB: loop body
LE: loop exit
PB: predicated region body
PF: predicated region fallthrough
CT: control target
= control target key end

     0   :  { %s582_s12 = smov 0   ;;  %s643_s0 = inlined_call_operand.vmem [shape: f32[2,8,362], index: 0, kind: input, shape index: {}]   ;;  %s644_s1 = inlined_call_operand.vmem [shape: bf16[8,72], index: 1, kind: input, shape index: {}]   ;;  %s645_s2 = inlined_call_operand.vmem [shape: f32[8,1], index: 2, kind: input, shape index: {}]   ;;  %s646_s3 = inlined_call_operand.vmem [shape: f32[2,8,324], index: 3, kind: output, shape index: {}]  }
   0x1 LB: > { %s450_s13 = sadd.s32 4294967295, %s549_s12   ;;  %p454_p0 = scmp.ge.s32.totalorder %s549_s12, 1  ;;  %s549_s12 = sphi %s582_s12, %s13_s12  }
   0x2   : > { %p137_p1 = scmp.lt.s32.totalorder %s549_s12, 3 }
   0x4   : > { %p138_p2 = pnand %p454_p0, %p137_p1 }
   0x5   : > { %p161_p3 = scmp.lt.s32.totalorder (!%p138_p2), %s450_s13, 1  ;;  %s552_s18 = smov (!%p138_p2), 92  }
   0x6   : > { %141 = sbr.rel (%p138_p2) target bundleno = 369 (0x171), region = 32  ;;  %s553_s19 = smov (!%p138_p2), 90  }
   0x7   : > { %s554_s20 = smov (!%p138_p2), 91   ;;  %s555_s21 = smov (!%p138_p2), 108  }
   0x8   : > { %s556_s22 = smov (!%p138_p2), 109   ;;  %s557_s23 = smov (!%p138_p2), 110  }
   0x9   : > { %s558_s24 = smov (!%p138_p2), 126   ;;  %s561_s25 = smov (!%p138_p2), 127  }
   0xb   : > { %s648_s13 = smov (!%p161_p3, %s450_s13), 1  ;;  %v551_v0 = vmov 0.0   ;;  %vm559_vm0 = vmmov 0   ;;  %v560_v6 = vmov 0   ;;  %v290_v7 = vld [vmem:[%s645_s2] sm:$0xff]  ;;  %vm244_vm1 = vcmask 752640  }
   0xc   : > { %468 = vmatprep.subr.bf16.mxu1 %v551_v0  ;;  %s482_s14 = smul.u32 24, %s648_s13  ;;  %478 = vmatprep.mubr.msk.bf16.mxu1 %vm559_vm0, %v551_v0  ;;  %vm268_vm2 = vcmask 736256   ;;  %vm256_vm3 = vcmask 744448   ;;  %vm300_vm4 = vcmask 1043456   ;;  %vm232_vm5 = vcmask 883712  }
   0xd   : > { %342 = vmatprep.mubr.bf16.mxu0 %v560_v6  ;;  %542 = vset.pattern.permute.xlu0 %v560_v6  ;;  %vm220_vm6 = vcmask 891904   ;;  %vm208_vm7 = vcmask 900096   ;;  %vm196_vm8 = vcmask 1031168   ;;  %vm184_vm9 = vcmask 1039360  }
   0xe   : > { %s165_s17 = scalar_lea.vmem %s643_s0, %s482_s14  ;;  %vm296_vm10 = vcmask 588800   ;;  %s170_s5 = scalar_lea.vmem %s646_s3, %s482_s14  ;;  %vm393_vm11 = vcmask 556032  }
   0xf   : > { %v599_v1 = vld [vmem:[%s165_s17 + $0x8] sm:$0xff]  ;;  %v601_v2 = vld [vmem:[%s165_s17 + $0x10] sm:$0xff]  ;;  %v603_v3 = vld [vmem:[%s165_s17] sm:$0xff] }
  0x10   : > { %v507_v4 = vpack.i.bf16 %v601_v2, %v599_v1  ;;  %v502_v5 = vpack.i.bf16 %v599_v1, %v603_v3 }
  0x12   : > { %508 = vrot.lane.b32.xlu1 %v507_v4, %s552_s18  ;;  %503 = vrot.lane.b32.xlu0 %v502_v5, %s553_s19 }
  0x16   : > { %513 = vrot.lane.b32.xlu1 %v507_v4, %s554_s20  ;;  %266 = vrot.lane.b32.xlu0 %v601_v2, %s553_s19 }
  0x1a   : > { %250 = vrot.lane.b32.xlu1 %v603_v3, %s554_s20  ;;  %238 = vrot.lane.b32.xlu0 %v603_v3, %s552_s18 }
  0x1e   : > { %523 = vrot.lane.b32.xlu1 %v507_v4, %s555_s21  ;;  %518 = vrot.lane.b32.xlu0 %v507_v4, %s556_s22 }
  0x22   : > { %226 = vrot.lane.b32.xlu1 %v603_v3, %s555_s21  ;;  %214 = vrot.lane.b32.xlu0 %v603_v3, %s556_s22 }
  0x26   : > { %533 = vrot.lane.b32.xlu1 %v507_v4, %s557_s23  ;;  %528 = vrot.lane.b32.xlu0 %v507_v4, %s558_s24 }
  0x2a   : > { %202 = vrot.lane.b32.xlu1 %v603_v3, %s557_s23  ;;  %190 = vrot.lane.b32.xlu0 %v603_v3, %s558_s24 }
  0x2e   : > { %538 = vrot.lane.b32.xlu0 %v507_v4, %s561_s25  ;;  %178 = vrot.lane.b32.xlu1 %v603_v3, %s561_s25 }
  0x32   : > { %293 = vperm.xlu0 %542, %v290_v7  }
  0x84   : > { %v509_v8 = vpop.permute.xlu1 %508  ;;  %v504_v9 = vpop.permute.xlu0 %503 }
  0x85   : > { %v511_v10 = vunpack.i.h.bf16 %v509_v8  ;;  %v510_v11 = vunpack.i.l.bf16 %v509_v8  ;;  %v506_v12 = vunpack.i.h.bf16 %v504_v9  ;;  %v505_v13 = vunpack.i.l.bf16 %v504_v9 }
  0x87   : > { %v269_v14 = vsel %vm268_vm2, %v505_v13, %v506_v12  ;;  %v246_v18 = vsel %vm244_vm1, %v510_v11, %v511_v10 }
  0x88   : > { %v514_v15 = vpop.permute.xlu1 %513  ;;  %v267_v16 = vpop.permute.xlu0 %266  ;;  %v286_v17 = vpack.c.bf16 %v269_v14, %v269_v14 }
  0x89   : > { %v516_v19 = vunpack.i.h.bf16 %v514_v15  ;;  %v515_v20 = vunpack.i.l.bf16 %v514_v15  ;;  %v288_v21 = vpack.c.bf16 %v267_v16, %v267_v16  ;;  %v270_v22 = vsel %vm268_vm2, %v506_v12, %v267_v16 }
  0x8a   : > { %v287_v23 = vpack.c.bf16 %v270_v22, %v270_v22  ;;  %v302_v28 = vsel %vm300_vm4, %v286_v17, 0 }
  0x8b   : > { %v308_v24 = vsel %vm300_vm4, %v288_v21, 0  ;;  %v258_v25 = vsel %vm256_vm3, %v515_v20, %v516_v19  ;;  %v285_v32 = vpack.c.bf16 %v516_v19, %v511_v10 }
  0x8c   : > { %v251_v26 = vpop.permute.xlu1 %250  ;;  %469 = vmatpush3.bf16.msra.mxu1 %v308_v24  ;;  %v239_v27 = vpop.permute.xlu0 %238  ;;  %457 = vmatprep.subr.msk.bf16.mxu0 %vm300_vm4, %v287_v23  ;;  %v284_v29 = vpack.c.bf16 %v258_v25, %v246_v18 }
  0x8d   : > { %v257_v30 = vsel %vm256_vm3, %v251_v26, %v515_v20  ;;  %v245_v31 = vsel %vm244_vm1, %v239_v27, %v510_v11  ;;  %317 = vmatpush1.bf16.msra.mxu0 %v302_v28  ;;  %470 = vmatprep.subr.bf16.mxu1 %v551_v0 }
  0x8e   : > { %v283_v33 = vpack.c.bf16 %v257_v30, %v245_v31  ;;  %318 = vmatprep.subr.bf16.mxu0 %v284_v29 }
  0x90   : > { %v524_v34 = vpop.permute.xlu1 %523  ;;  %471 = vmatpush3.bf16.msra.mxu1 %v285_v32  ;;  %v519_v35 = vpop.permute.xlu0 %518 }
  0x91   : > { %v526_v36 = vunpack.i.h.bf16 %v524_v34  ;;  %v525_v37 = vunpack.i.l.bf16 %v524_v34  ;;  %v521_v38 = vunpack.i.h.bf16 %v519_v35  ;;  %v520_v39 = vunpack.i.l.bf16 %v519_v35  ;;  %319 = vmatpush1.bf16.msra.mxu0 %v283_v33  ;;  %472 = vmatprep.subr.bf16.mxu1 %v551_v0 }
  0x93   : > { %v282_v40 = vpack.c.bf16 %v526_v36, %v521_v38  ;;  %v222_v41 = vsel %vm220_vm6, %v520_v39, %v521_v38  ;;  %v234_v42 = vsel %vm232_vm5, %v525_v37, %v526_v36 }
  0x94   : > { %v227_v43 = vpop.permute.xlu1 %226  ;;  %v215_v44 = vpop.permute.xlu0 %214  ;;  %v281_v45 = vpack.c.bf16 %v234_v42, %v222_v41 }
  0x95   : > { %v233_v46 = vsel %vm232_vm5, %v227_v43, %v525_v37  ;;  %v221_v47 = vsel %vm220_vm6, %v215_v44, %v520_v39  ;;  %473 = vmatpush3.bf16.msra.mxu1 %v282_v40 }
  0x96   : > { %v280_v48 = vpack.c.bf16 %v233_v46, %v221_v47  ;;  %320 = vmatprep.subr.bf16.mxu0 %v281_v45  ;;  %474 = vmatprep.subr.bf16.mxu1 %v551_v0 }
  0x98   : > { %v534_v49 = vpop.permute.xlu1 %533  ;;  %v529_v50 = vpop.permute.xlu0 %528  ;;  %321 = vmatpush1.bf16.msra.mxu0 %v280_v48 }
  0x99   : > { %v536_v51 = vunpack.i.h.bf16 %v534_v49  ;;  %v535_v52 = vunpack.i.l.bf16 %v534_v49  ;;  %v531_v53 = vunpack.i.h.bf16 %v529_v50  ;;  %v530_v54 = vunpack.i.l.bf16 %v529_v50 }
  0x9b   : > { %v279_v55 = vpack.c.bf16 %v536_v51, %v531_v53  ;;  %v198_v56 = vsel %vm196_vm8, %v530_v54, %v531_v53  ;;  %v210_v57 = vsel %vm208_vm7, %v535_v52, %v536_v51 }
  0x9c   : > { %v203_v58 = vpop.permute.xlu1 %202  ;;  %v191_v59 = vpop.permute.xlu0 %190  ;;  %v278_v60 = vpack.c.bf16 %v210_v57, %v198_v56 }
  0x9d   : > { %v209_v61 = vsel %vm208_vm7, %v203_v58, %v535_v52  ;;  %v197_v62 = vsel %vm196_vm8, %v191_v59, %v530_v54  ;;  %475 = vmatpush3.bf16.msra.mxu1 %v279_v55 }
  0x9e   : > { %v277_v63 = vpack.c.bf16 %v209_v61, %v197_v62  ;;  %322 = vmatprep.subr.bf16.mxu0 %v278_v60  ;;  %476 = vmatprep.subr.bf16.mxu1 %v551_v0  ;;  %v289_v0 = vld [vmem:[%s644_s1] sm:$0xf] }
  0xa0   : > { %v539_v4 = vpop.permute.xlu0 %538  ;;  %323 = vmatpush1.bf16.msra.mxu0 %v277_v63  ;;  %v179_v5 = vpop.permute.xlu1 %178 }
  0xa1   : > { %v541_v6 = vunpack.i.h.bf16 %v539_v4  ;;  %v540_v7 = vunpack.i.l.bf16 %v539_v4 }
  0xa3   : > { %v276_v8 = vpack.c.bf16 %v541_v6, %v601_v2  ;;  %v185_v9 = vsel %vm184_vm9, %v179_v5, %v540_v7  ;;  %v186_v10 = vsel %vm184_vm9, %v540_v7, %v541_v6 }
  0xa4   : > { %v274_v11 = vpack.c.bf16 %v185_v9, %v603_v3  ;;  %v275_v12 = vpack.c.bf16 %v186_v10, %v599_v1 }
  0xa5   : > { %477 = vmatpush3.bf16.msra.mxu1 %v276_v8 }
  0xa6   : > { %324 = vmatprep.subr.bf16.mxu0 %v275_v12 }
  0xa7   : > { %325 = vmatpush1.bf16.msra.mxu0 %v274_v11 }
  0xa8   : > { %479 = vmatmul.mubr.msk.bf16.vlgmr.msra.gmra.mxu1 %vm296_vm10, %v289_v0 }
  0xaa   : > { %458 = vmatmul.mubr.msk.bf16.vlgmr.msra.gmra.mxu0 %vm296_vm10, %v289_v0 }
  0xad   : > { %v294_v13 = vpop.permute.xlu0 %293 }
 0x168   : > { %v385_v14 = vpop.f32.mrf.mxu1 }
 0x169   : > { %v386_v2 = vadd.f32 %v385_v14, %v294_v13 }
 0x16a   : > { %v344_v1 = vpop.f32.mrf.mxu0  ;;  %v480_v3 = vpop.f32.mrf.mxu1 }
 0x16b   : > { %v345_v15 = vadd.f32 %v344_v1, %v294_v13  ;;  %394 = vst.msk [vmem:[%s170_s5 + $0x10] sm:$0xff] %vm393_vm11, %v386_v2 }
 0x16c   : > { %v346_v16 = vpop.f32.mrf.mxu0  ;;  %v388_v17 = vpop.f32.mrf.mxu1 }
 0x16d   : > { %391 = vst [vmem:[%s170_s5] sm:$0xff] %v345_v15  ;;  %v347_v18 = vadd.f32 %v346_v16, %v294_v13 }
 0x16e   : > { %v348_v19 = vpop.f32.mrf.mxu0  ;;  %v481_v20 = vpop.f32.mrf.mxu1 }
 0x16f   : > { %392 = vst [vmem:[%s170_s5 + $0x8] sm:$0xff] %v347_v18 }
 0x170   : > { %v349_v21 = vpop.f32.mrf.mxu0 }
 0x171 PF: > { %s13_s12 = sadd.s32 1, %s549_s12  }
 0x172   : > { %p10_p4 = scmp.ge.s32.totalorder %s13_s12, 4  }
 0x174   :  { %12 = sbr.rel (!%p10_p4) target bundleno = 1 (0x1), region = 62 }

// kernel: hnet_conv_block.5
= control target key start
LH: loop header
LB: loop body
LE: loop exit
PB: predicated region body
PF: predicated region fallthrough
CT: control target
= control target key end

     0   :  { %s580_s24 = smov 0   ;;  %s628_s0 = inlined_call_operand.vmem [shape: f32[8,512], index: 0, kind: input, shape index: {}]   ;;  %s629_s1 = inlined_call_operand.vmem [shape: f32[8,1], index: 1, kind: input, shape index: {}]   ;;  %s630_s2 = inlined_call_operand.vmem [shape: f32[8,1], index: 2, kind: input, shape index: {}]   ;;  %s631_s3 = inlined_call_operand.vmem [shape: bf16[8,8], index: 3, kind: input, shape index: {}]   ;;  %s632_s4 = inlined_call_operand.vmem [shape: f32[8,1], index: 4, kind: input, shape index: {}]   ;;  %s633_s5 = inlined_call_operand.vmem [shape: bf16[8,8], index: 5, kind: input, shape index: {}]   ;;  %s634_s6 = inlined_call_operand.vmem [shape: f32[8,1], index: 6, kind: input, shape index: {}]   ;;  %s635_s7 = inlined_call_operand.vmem [shape: f32[8,512], index: 7, kind: output, shape index: {}]  }
   0x1 LB: > { %s495_s25 = sadd.s32 4294967295, %s537_s24   ;;  %p499_p0 = scmp.ge.s32.totalorder %s537_s24, 1  ;;  %s537_s24 = sphi %s580_s24, %s17_s24  }
   0x2   : > { %p238_p1 = scmp.lt.s32.totalorder %s537_s24, 3 }
   0x4   : > { %p239_p2 = pnand %p499_p0, %p238_p1 }
   0x5   : > { %s500_s11 = sshll.u32 (!%p239_p2), %s495_s25, 1 }
   0x6   : > { %242 = sbr.rel (%p239_p2) target bundleno = 586 (0x24a), region = 48  ;;  %p271_p3 = scmp.lt.s32.totalorder (!%p239_p2), %s500_s11, 3 }
   0xb   : > { %v285_v0 = vld [vmem:[%s629_s1] sm:$0xff]  ;;  %v539_v1 = vmov 0   ;;  %s637_s11 = smov (!%p271_p3, %s500_s11), 3  ;;  %vm314_vm0 = vcmask 1043456   ;;  %vm310_vm1 = vcmask 64512  }
   0xc   : > { %521 = vset.pattern.permute.xlu0 %v539_v1  ;;  %353 = vmatprep.mubr.bf16.mxu0 %v539_v1  ;;  %v293_v2 = vld [vmem:[%s630_s2] sm:$0xff]  ;;  %s501_s12 = sshll.u32 %s637_s11, 3 }
   0xd   : > { %288 = vperm.xlu0 %521, %v285_v0   ;;  %522 = vset.pattern.permute.xlu1 %v539_v1  ;;  %v304_v3 = vld [vmem:[%s632_s4] sm:$0xff]  ;;  %s274_s15 = scalar_lea.vmem %s628_s0, %s501_s12  ;;  %s280_s22 = scalar_lea.vmem %s635_s7, %s501_s12 }
   0xe   : > { %414 = vmatprep.mubr.bf16.mxu1 %v539_v1  ;;  %307 = vperm.xlu1 %522, %v304_v3   ;;  %v367_v4 = vld [vmem:[%s634_s6] sm:$0xff]  ;;  %v284_v7 = vld [vmem:[%s274_s15 + $0x8] sm:$0xff] }
   0xf   : > { %v283_v6 = vld [vmem:[%s274_s15] sm:$0xff] }
  0x10   : > { %v303_v16 = vld [vmem:[%s631_s3] sm:$0xf] }
  0x11   : > { %296 = vperm.xlu0 %521, %v293_v2   ;;  %v364_v29 = vld [vmem:[%s633_s5] sm:$0xf] }
  0x12   : > { %370 = vperm.xlu1 %522, %v367_v4  }
  0x88   : > { %v289_v5 = vpop.permute.xlu0 %288 }
  0x89   : > { %v291_v8 = vmul.f32 %v289_v5, %v283_v6  ;;  %v292_v9 = vmul.f32 %v289_v5, %v284_v7  ;;  %v308_v17 = vpop.permute.xlu1 %307 }
  0x8c   : > { %v297_v10 = vpop.permute.xlu0 %296 }
  0x8d   : > { %v299_v11 = vadd.f32 %v297_v10, %v291_v8  ;;  %v300_v12 = vadd.f32 %v297_v10, %v292_v9  ;;  %v371_v30 = vpop.permute.xlu1 %370 }
  0x8f   : > { %v302_v13 = vpack.c.bf16 %v300_v12, %v300_v12  ;;  %v301_v14 = vpack.c.bf16 %v299_v11, %v299_v11 }
  0x91   : > { %504 = vmatprep.subr.msk.bf16.mxu0 %vm314_vm0, %v302_v13  ;;  %v316_v15 = vsel %vm314_vm0, %v301_v14, 0 }
  0x92   : > { %336 = vmatpush1.bf16.msra.mxu0 %v316_v15 }
  0x95   : > { %505 = vmatmul.mubr.msk.bf16.vlgmr.msra.gmra.mxu0 %vm310_vm1, %v303_v16 }
 0x155   : > { %v355_v18 = vpop.f32.mrf.mxu0 }
 0x156   : > { %v356_v19 = vadd.f32 %v355_v18, %v308_v17 }
 0x157   : > { %v357_v20 = vpop.f32.mrf.mxu0 }
 0x158   : > { %v362_v21 = vmax.f32 %v356_v19, 0.0  ;;  %v358_v22 = vadd.f32 %v357_v20, %v308_v17 }
 0x159   : > { %v359_v23 = vpop.f32.mrf.mxu0 }
 0x15a   : > { %v365_v24 = vpack.c.bf16 %v362_v21, %v362_v21  ;;  %v363_v25 = vmax.f32 %v358_v22, 0.0 }
 0x15b   : > { %v360_v26 = vpop.f32.mrf.mxu0 }
 0x15c   : > { %v366_v27 = vpack.c.bf16 %v363_v25, %v363_v25  ;;  %v377_v28 = vsel %vm314_vm0, %v365_v24, 0 }
 0x15e   : > { %506 = vmatprep.subr.msk.bf16.mxu1 %vm314_vm0, %v366_v27 }
 0x15f   : > { %397 = vmatpush1.bf16.msra.mxu1 %v377_v28 }
 0x162   : > { %507 = vmatmul.mubr.msk.bf16.vlgmr.msra.gmra.mxu1 %vm310_vm1, %v364_v29 }
 0x222   : > { %v416_v31 = vpop.f32.mrf.mxu1 }
 0x223   : > { %v417_v32 = vadd.f32 %v416_v31, %v371_v30 }
 0x224   : > { %v418_v33 = vpop.f32.mrf.mxu1 }
 0x225   : > { %v508_v34 = vmul.f32 -1.442695, %v417_v32  ;;  %v419_v35 = vadd.f32 %v418_v33, %v371_v30 }
 0x226   : > { %v420_v36 = vpop.f32.mrf.mxu1 }
 0x227   : > { %523 = vpow2.f32 %v508_v34  ;;  %v509_v37 = vmul.f32 -1.442695, %v419_v35 }
 0x228   : > { %v421_v38 = vpop.f32.mrf.mxu1 }
 0x229   : > { %525 = vpow2.f32 %v509_v37 }
 0x234   : > { %v524_v39 = vpop.eup %523 }
 0x235   : > { %v429_v40 = vadd.f32 1.0, %v524_v39 }
 0x236   : > { %v526_v41 = vpop.eup %525 }
 0x237   : > { %527 = vrcp.f32 %v429_v40  ;;  %v430_v42 = vadd.f32 1.0, %v526_v41 }
 0x239   : > { %529 = vrcp.f32 %v430_v42 }
 0x244   : > { %v528_v43 = vpop.eup %527 }
 0x245   : > { %v435_v44 = vmul.f32 %v528_v43, %v299_v11 }
 0x246   : > { %v530_v45 = vpop.eup %529 }
 0x247   : > { %437 = vst [vmem:[%s280_s22] sm:$0xff] %v435_v44  ;;  %v436_v46 = vmul.f32 %v530_v45, %v300_v12 }
 0x249   : > { %438 = vst [vmem:[%s280_s22 + $0x8] sm:$0xff] %v436_v46 }
 0x24a PF: > { %s17_s24 = sadd.s32 1, %s537_s24  }
 0x24b   : > { %p14_p4 = scmp.ge.s32.totalorder %s17_s24, 4  }
 0x24d   :  { %16 = sbr.rel (!%p14_p4) target bundleno = 1 (0x1), region = 78 }

</bundles_post_ra>
